<compile_context>
chip_gen: v7x
topology: tpu7x:2x2x1
jax: 0.10.0
libtpu: 0.0.40
codegen_flags: <defaults>
</compile_context>

<pallas_src>
import math

import jax
import jax.numpy as jnp
from jax.experimental import pallas as pl
from jax.experimental.pallas import tpu as pltpu

_LANE = 128              # class axis padded to lane width for the in-VMEM compute
_MAX_BATCH_TILE = 1024
_MIN_BATCH_TILE = 256
_SMALL_BATCH = 256       # at/below this: gridless path (per-step overhead dominates)
_VMEM_SOFT_CAP = 40 << 20  # keep well under v7x's 64 MiB physical VMEM per TC


def _linear_logsoftmax_kernel(x_ref, w_ref, b_ref, o_ref):
    """Fused cast + Linear (bf16 MXU, f32 acc) + LogSoftmax + unpadded store.

    x_ref: (TB, D)    f32   -- cast to bf16 in-kernel (no extra HBM copy of x)
    w_ref: (D, C_pad) bf16  -- zero columns in the lane pad
    b_ref: (1, C_pad) f32   -- -inf in the lane pad (keeps pad out of the LSE)
    o_ref: (TB, C)    f32   -- C = num_classes; only real classes hit HBM
    """
    x_bf = x_ref[...].astype(jnp.bfloat16)
    logits = jnp.dot(x_bf, w_ref[...], preferred_element_type=jnp.float32)
    logits = logits + b_ref[...]

    # Numerically-stable log-softmax over the (padded) class axis, all in f32.
    # Padded lanes have logit == -inf -> exp(-inf - m) == 0, so they never
    # perturb the max or the logsumexp.  (Do NOT "simplify" the -inf pad to 0.)
    m = jnp.max(logits, axis=-1, keepdims=True)
    shifted = logits - m
    lse = jnp.log(jnp.sum(jnp.exp(shifted), axis=-1, keepdims=True))
    out = shifted - lse

    # Store only the real num_classes columns (masked VMEM store, dense HBM
    # rows) instead of writing + re-slicing 128 padded f32 lanes.
    o_ref[...] = out[:, : o_ref.shape[-1]].astype(o_ref.dtype)


def prepare_params(w_pt, b_pt):
    """One-time param prep. w_pt: [C, D] (PyTorch layout), b_pt: [C].

    Returns (w_t, b_row): w_t is [D, C_pad] bf16 (zero-padded columns),
    b_row is [1, C_pad] f32 with -inf in the padded slots.
    """
    C, D = w_pt.shape
    C_pad = max(_LANE, -(-C // _LANE) * _LANE)
    w_t = (
        jnp.zeros((D, C_pad), jnp.bfloat16)
        .at[:, :C]
        .set(jnp.transpose(w_pt).astype(jnp.bfloat16))
    )
    b_row = (
        jnp.full((1, C_pad), -jnp.inf, jnp.float32)
        .at[0, :C]
        .set(b_pt.astype(jnp.float32))
    )
    return w_t, b_row


def _tiled_vmem_bytes(tb, D, C_pad):
    return (
        2 * tb * D * 4         # f32 x tiles (double-buffered)
        + 2 * tb * C_pad * 4   # output tiles (lane-padded in VMEM, double-buffered)
        + 2 * D * C_pad * 2    # resident bf16 weight (2 pipeline buffers)
        + 2 * 8 * C_pad * 4    # resident bias (sublane-padded f32)
    )


def _pick_batch_tile(B, D, C_pad):
    tb = _MAX_BATCH_TILE
    # Fit comfortably in VMEM on every generation (v7x: 64 MiB physical / TC).
    while tb > _MIN_BATCH_TILE and _tiled_vmem_bytes(tb, D, C_pad) > _VMEM_SOFT_CAP:
        tb //= 2
    # v7x megacore: want >= 4 grid steps (>= 2 per TensorCore) so the x-tile
    # DMA overlaps compute instead of being fully exposed.
    while tb > _MIN_BATCH_TILE and pl.cdiv(B, tb) < 4:
        tb //= 2
    return tb


def linear_classifier(x, w_t, b_row, num_classes):
    """x: [B, D] f32, w_t: [D, C_pad] bf16, b_row: [1, C_pad] f32 -> [B, C] f32."""
    B, D = x.shape
    C_pad = w_t.shape[1]
    assert w_t.shape[0] == D and b_row.shape == (1, C_pad)
    assert num_classes <= C_pad

    out_shape = jax.ShapeDtypeStruct((B, num_classes), jnp.float32)

    if B <= _SMALL_BATCH:
        # Small batch: everything lives in VMEM, no grid (per-step overhead
        # would dominate at B ~ 8).  One launch: cast + linear + logsoftmax.
        return pl.pallas_call(
            _linear_logsoftmax_kernel,
            out_shape=out_shape,
            in_specs=[
                pl.BlockSpec(memory_space=pltpu.MemorySpace.VMEM),
                pl.BlockSpec(memory_space=pltpu.MemorySpace.VMEM),
                pl.BlockSpec(memory_space=pltpu.MemorySpace.VMEM),
            ],
            out_specs=pl.BlockSpec(memory_space=pltpu.MemorySpace.VMEM),
        )(x, w_t, b_row)

    # Tiled path: 1-D grid over the batch; ragged batch sizes are handled by
    # the cdiv grid (out-of-bounds rows of the last tile are masked on store),
    # so large non-multiple B never falls back to an all-in-VMEM path.
    TB = _pick_batch_tile(B, D, C_pad)
    grid = (pl.cdiv(B, TB),)
    vmem_budget = _tiled_vmem_bytes(TB, D, C_pad) + (4 << 20)  # compiler headroom

    return pl.pallas_call(
        _linear_logsoftmax_kernel,
        out_shape=out_shape,
        grid_spec=pltpu.PrefetchScalarGridSpec(
            num_scalar_prefetch=0,
            grid=grid,
            in_specs=[
                pl.BlockSpec((TB, D), lambda i: (i, 0)),      # x tile (f32)
                pl.BlockSpec((D, C_pad), lambda i: (0, 0)),   # resident weight
                pl.BlockSpec((1, C_pad), lambda i: (0, 0)),   # resident bias
            ],
            # Unpadded output block: last dim == full array dim -> legal spec.
            out_specs=pl.BlockSpec((TB, num_classes), lambda i: (i, 0)),
        ),
        compiler_params=pltpu.CompilerParams(
            dimension_semantics=("parallel",),
            vmem_limit_bytes=min(max(vmem_budget, 32 << 20), 48 << 20),
        ),
    )(x, w_t, b_row)


if __name__ == "__main__":
    # Small shapes consistent with the module's forward: x is [B, input_size].
    batch = 8
    input_size = 256
    num_classes = 20

    key = jax.random.PRNGKey(0)
    kx, kw, kb, kx2, kx3 = jax.random.split(key, 5)

    # Deterministic param init mirroring nn.Linear's default:
    # U(-1/sqrt(in_features), +1/sqrt(in_features)) for weight and bias.
    bound = 1.0 / math.sqrt(input_size)
    w_pt = jax.random.uniform(  # PyTorch layout: [out_features, in_features]
        kw, (num_classes, input_size), jnp.float32, minval=-bound, maxval=bound
    )
    b_pt = jax.random.uniform(
        kb, (num_classes,), jnp.float32, minval=-bound, maxval=bound
    )

    # One-time weight transpose / lane padding (static params).
    w_t, b_row = prepare_params(w_pt, b_pt)

    def ref_bf16(xv):
        # Reference with the same operand precision as the kernel.
        logits = jnp.dot(
            xv.astype(jnp.bfloat16),
            w_t[:, :num_classes],
            preferred_element_type=jnp.float32,
        ) + b_row[:, :num_classes]
        return jax.nn.log_softmax(logits, axis=-1)

    def ref_f32(xv):
        return jax.nn.log_softmax(xv @ jnp.transpose(w_pt) + b_pt[None, :], axis=-1)

    # --- Small-batch (gridless) path ---
    x = jax.random.normal(kx, (batch, input_size), jnp.float32)
    out = jax.block_until_ready(linear_classifier(x, w_t, b_row, num_classes))
    assert out.shape == (batch, num_classes)
    assert jnp.allclose(out, ref_bf16(x), atol=2e-3, rtol=2e-3)
    assert jnp.allclose(out, ref_f32(x), atol=5e-2, rtol=5e-2)

    # --- Larger batch: tiled, megacore-parallel path (exact tile multiple) ---
    x_big = jax.random.normal(kx2, (1024, input_size), jnp.float32)
    out_big = jax.block_until_ready(
        linear_classifier(x_big, w_t, b_row, num_classes)
    )
    assert out_big.shape == (1024, num_classes)
    assert jnp.allclose(out_big, ref_bf16(x_big), atol=2e-3, rtol=2e-3)

    # --- Ragged batch: cdiv grid with masked last tile ---
    x_rag = jax.random.normal(kx3, (1000, input_size), jnp.float32)
    out_rag = jax.block_until_ready(
        linear_classifier(x_rag, w_t, b_row, num_classes)
    )
    assert out_rag.shape == (1000, num_classes)
    assert jnp.allclose(out_rag, ref_bf16(x_rag), atol=2e-3, rtol=2e-3)

    print("KERNEL_OK")
</pallas_src>

<mosaic_0001>
module attributes {stable_mosaic.version = 11 : i64} {
  func.func @_linear_logsoftmax_kernel(%arg0: memref<8x256xf32, #tpu.memory_space<vmem>>, %arg1: memref<256x128xbf16, #tpu.memory_space<vmem>>, %arg2: memref<1x128xf32, #tpu.memory_space<vmem>>, %arg3: memref<8x20xf32, #tpu.memory_space<vmem>>) attributes {dimension_semantics = [], scalar_prefetch = 0 : i64, scratch_operands = 0 : i64, tpu.core_type = #tpu.core_type<tc>} {
    %c0 = arith.constant 0 : index
    %c0_0 = arith.constant 0 : index
    %0 = vector.load %arg0[%c0, %c0_0] : memref<8x256xf32, #tpu.memory_space<vmem>>, vector<8x256xf32>
    %1 = arith.truncf %0 : vector<8x256xf32> to vector<8x256xbf16>
    %c0_1 = arith.constant 0 : index
    %c0_2 = arith.constant 0 : index
    %2 = vector.load %arg1[%c0_1, %c0_2] : memref<256x128xbf16, #tpu.memory_space<vmem>>, vector<256x128xbf16>
    %cst = arith.constant dense<0.000000e+00> : vector<8x128xf32>
    %3 = tpu.matmul %1, %2, %cst {dimension_numbers = #tpu.dot_dimension_numbers<[1], [0], [0], [1], [0, 0, 1, 1], [], []>} : vector<8x256xbf16>, vector<256x128xbf16>, vector<8x128xf32> -> vector<8x128xf32>
    %c0_3 = arith.constant 0 : index
    %c0_4 = arith.constant 0 : index
    %4 = vector.load %arg2[%c0_3, %c0_4] : memref<1x128xf32, #tpu.memory_space<vmem>>, vector<1x128xf32>
    %5 = vector.broadcast %4 : vector<1x128xf32> to vector<8x128xf32>
    %6 = arith.addf %3, %5 : vector<8x128xf32>
    %cst_5 = arith.constant dense<0xFF800000> : vector<8xf32>
    %7 = vector.multi_reduction <maximumf>, %6, %cst_5 [1] : vector<8x128xf32> to vector<8xf32>
    %8 = vector.shape_cast %7 : vector<8xf32> to vector<8x1xf32>
    %9 = vector.broadcast %8 : vector<8x1xf32> to vector<8x128xf32>
    %10 = arith.subf %6, %9 : vector<8x128xf32>
    %11 = math.exp %10 : vector<8x128xf32>
    %cst_6 = arith.constant dense<0.000000e+00> : vector<8xf32>
    %12 = vector.multi_reduction <add>, %11, %cst_6 [1] : vector<8x128xf32> to vector<8xf32>
    %13 = vector.shape_cast %12 : vector<8xf32> to vector<8x1xf32>
    %14 = math.log %13 : vector<8x1xf32>
    %15 = vector.broadcast %14 : vector<8x1xf32> to vector<8x128xf32>
    %16 = arith.subf %10, %15 : vector<8x128xf32>
    %17 = vector.extract_strided_slice %16 {offsets = [0, 0], sizes = [8, 20], strides = [1, 1]} : vector<8x128xf32> to vector<8x20xf32>
    %c0_7 = arith.constant 0 : index
    %c0_8 = arith.constant 0 : index
    %18 = vector.load %arg3[%c0_7, %c0_8] : memref<8x20xf32, #tpu.memory_space<vmem>>, vector<8x20xf32>
    tpu.vector_store %arg3[%c0_7, %c0_8], %17 {strides = array<i32>} : memref<8x20xf32, #tpu.memory_space<vmem>>, vector<8x20xf32>,
    return
  }
}

</mosaic_0001>

<bundles_post_ra>
// kernel: tpu_custom_call.1
= control target key start
LH: loop header
LB: loop body
LE: loop exit
PB: predicated region body
PF: predicated region fallthrough
CT: control target
= control target key end

     0   :  { %8 = vsyncpa [#allocation3], 0  ;;  %s456_s0 = inlined_call_operand.hbm [shape: f32[8,256], index: 0, kind: input, shape index: {}]   ;;  %s457_s1 = inlined_call_operand.hbm [shape: bf16[256,128], index: 1, kind: input, shape index: {}]   ;;  %s458_s2 = inlined_call_operand.vmem [shape: f32[1,128], index: 2, kind: input, shape index: {}]   ;;  %s459_s3 = inlined_call_operand.hbm [shape: f32[8,20], index: 3, kind: output, shape index: {}]  }
   0x1   :  { %9 = vsyncpa [#allocation6], 0 }
   0x2   :  { %10 = vsyncpa [#allocation4], 0  ;;  %s385_s12 = smov [#allocation2]   ;;  %s386_s14 = smov [#allocation5]  }
   0x3   :  { %s17_s13 = sshll.u32 %s385_s12, 4  ;;  %s26_s15 = sshll.u32 %s386_s14, 4  ;;  %s18_s13 = int_to_ptr.vmem [resolvable:$true] %s17_s13  ;;  %s410_s15 = int_to_ptr.vmem [resolvable:$true] %s26_s15 }
   0x4   :  { %s313_s18 = scalar_lea.hbm %s456_s0, 256 }
   0x5   :  { %p314_p0 = scmp.ne.s32.totalorder %s456_s0, %s313_s18  ;;  %p317_p1 = scmp.lt.u32.totalorder %s313_s18, %s456_s0 }
   0x7   :  { %p319_p2 = pnand %p317_p1, %p314_p0 }
   0x9   :  { %322 = shalt.err (!%p319_p2)
}
   0xa   :  { %s323_s23 = scalar_lea.vmem %s18_s13, 256  ;;  %p328_p4 = scmp.lt.s32.totalorder %s18_s13, %s18_s13 }
   0xb   :  { %p324_p3 = scmp.ne.s32.totalorder %s18_s13, %s323_s23  ;;  %p329_p5 = scmp.lt.s32.totalorder %s323_s23, %s323_s23 }
   0xd   :  { %p330_p6 = por %p329_p5, %p328_p4 }
   0xf   :  { %p331_p7 = pnand %p330_p6, %p324_p3 }
  0x11   :  { %334 = shalt.err (!%p331_p7)
}
  0x12   :  { %20 = dma.hbm_to_vmem [thread:$0]  %s456_s0, 256, %s18_s13, [#allocation3]  }
  0x13   :  { %s335_s28 = scalar_lea.hbm %s457_s1, 2048 }
  0x14   :  { %p336_p8 = scmp.ne.s32.totalorder %s457_s1, %s335_s28  ;;  %p339_p9 = scmp.lt.u32.totalorder %s335_s28, %s457_s1 }
  0x16   :  { %p341_p10 = pnand %p339_p9, %p336_p8 }
  0x18   :  { %344 = shalt.err (!%p341_p10)
}
  0x19   :  { %s345_s6 = scalar_lea.vmem %s410_s15, 2048  ;;  %p350_p12 = scmp.lt.s32.totalorder %s410_s15, %s410_s15 }
  0x1a   :  { %p346_p11 = scmp.ne.s32.totalorder %s410_s15, %s345_s6  ;;  %p351_p13 = scmp.lt.s32.totalorder %s345_s6, %s345_s6 }
  0x1c   :  { %p352_p0 = por %p351_p13, %p350_p12 }
  0x1e   :  { %p353_p1 = pnand %p352_p0, %p346_p11 }
  0x20   :  { %356 = shalt.err (!%p353_p1)
}
  0x21   :  { %s387_s0 = smov 64   ;;  %s388_s7 = smov 4  }
  0x22   :  { %32 = dma.hbm_to_vmem [thread:$0]  %s457_s1, 2048, %s410_s15, [#allocation6], %s387_s0, %s387_s0, %s388_s7  }
  0x23   :  { %379 = dma.done.wait [#allocation3], 256  }
  0x24   :  { %380 = vsyncadd [#allocation3], 4294967040 }
  0x25   :  { %381 = dma.done.wait [#allocation6], 2048  }
  0x26   :  { %382 = vsyncadd [#allocation6], 4294965248  ;;  %v293_v0 = vld [vmem:[#allocation5 + $0x40] sm:$0xff]   ;;  %v295_v2 = vld [vmem:[#allocation5 + $0x48] sm:$0xff]   ;;  %s389_s11 = smov [#allocation7]   ;;  %vm231_vm0 = vcmask 162816  }
  0x27   :  { %v294_v1 = vld [vmem:[#allocation5] sm:$0xff]   ;;  %266 = vmatprep.subr.bf16.mxu0 %v293_v0  ;;  %v296_v3 = vld [vmem:[#allocation5 + $0x8] sm:$0xff]   ;;  %v297_v4 = vld [vmem:[#allocation5 + $0x50] sm:$0xff]   ;;  %s239_s12 = sshll.u32 %s389_s11, 4  ;;  %s240_s12 = int_to_ptr.vmem [resolvable:$true] %s239_s12 }
  0x28   :  { %267 = vmatpush3.bf16.msra.mxu0 %v294_v1  ;;  %v298_v5 = vld [vmem:[#allocation5 + $0x10] sm:$0xff]   ;;  %v299_v6 = vld [vmem:[#allocation5 + $0x58] sm:$0xff]   ;;  %v301_v8 = vld [vmem:[#allocation5 + $0x60] sm:$0xff]   ;;  %p362_p3 = scmp.lt.s32.totalorder %s240_s12, %s240_s12 }
  0x29   :  { %268 = vmatprep.subr.bf16.mxu0 %v295_v2  ;;  %v300_v7 = vld [vmem:[#allocation5 + $0x18] sm:$0xff]   ;;  %v302_v9 = vld [vmem:[#allocation5 + $0x20] sm:$0xff]   ;;  %v303_v10 = vld [vmem:[#allocation5 + $0x68] sm:$0xff]  }
  0x2a   :  { %v43_v11 = vld [vmem:[#allocation2 + $0x8] sm:$0xff]  ;;  %v304_v13 = vld [vmem:[#allocation5 + $0x28] sm:$0xff]   ;;  %v305_v14 = vld [vmem:[#allocation5 + $0x70] sm:$0xff]  }
  0x2b   :  { %v45_v12 = vpack.c.bf16 %v43_v11, %v43_v11  ;;  %v306_v15 = vld [vmem:[#allocation5 + $0x30] sm:$0xff]   ;;  %v307_v16 = vld [vmem:[#allocation5 + $0x78] sm:$0xff]  }
  0x2c   :  { %269 = vmatpush3.bf16.msra.mxu0 %v296_v3  ;;  %v308_v17 = vld [vmem:[#allocation5 + $0x38] sm:$0xff]   ;;  %v42_v18 = vld [vmem:[#allocation2] sm:$0xff] }
  0x2d   :  { %270 = vmatprep.subr.bf16.mxu0 %v297_v4  ;;  %213 = vmatprep.mubr.bf16.mxu0 %v45_v12  ;;  %v44_v19 = vpack.c.bf16 %v42_v18, %v42_v18  ;;  %v249_v22 = vld [vmem:[%s458_s2] ss:$0 sm:$0xff]  ;;  %s357_s2 = scalar_lea.vmem %s240_s12, 128 }
  0x2e   :  { %p358_p2 = scmp.ne.s32.totalorder %s240_s12, %s357_s2  ;;  %p363_p4 = scmp.lt.s32.totalorder %s357_s2, %s357_s2 }
  0x30   :  { %271 = vmatpush3.bf16.msra.mxu0 %v298_v5  ;;  %p364_p5 = por %p363_p4, %p362_p3 }
  0x31   :  { %272 = vmatprep.subr.bf16.mxu0 %v299_v6 }
  0x32   :  { %p365_p6 = pnand %p364_p5, %p358_p2 }
  0x34   :  { %273 = vmatpush3.bf16.msra.mxu0 %v300_v7 }
  0x35   :  { %274 = vmatprep.subr.bf16.mxu0 %v301_v8 }
  0x38   :  { %275 = vmatpush3.bf16.msra.mxu0 %v302_v9 }
  0x39   :  { %276 = vmatprep.subr.bf16.mxu0 %v303_v10 }
  0x3c   :  { %277 = vmatpush3.bf16.msra.mxu0 %v304_v13 }
  0x3d   :  { %278 = vmatprep.subr.bf16.mxu0 %v305_v14 }
  0x40   :  { %279 = vmatpush3.bf16.msra.mxu0 %v306_v15 }
  0x41   :  { %280 = vmatprep.subr.bf16.mxu0 %v307_v16 }
  0x44   :  { %281 = vmatpush3.bf16.msra.mxu0 %v308_v17 }
  0x47   :  { %214 = vmatmul.mubr.bf16.vlgmr.msra.gmra.mrb[0].mxu0 %v44_v19 }
 0x11a   :  { %v282_v20 = vpop.f32.mrb[0].mxu0 }
 0x11b   :  { %v283_v21 = vpop.f32.mrb[1].mxu0 }
 0x11c   :  { %v284_v23 = vadd.f32 %v283_v21, %v282_v20  ;;  %v285_v24 = vpop.f32.mrb[2].mxu0 }
 0x11d   :  { %v286_v25 = vpop.f32.mrb[3].mxu0 }
 0x11e   :  { %v216_v26 = vadd.f32 %v284_v23, %v249_v22 }
 0x120   :  { %221 = vmax.xlane.f32.xlu0 %v216_v26 }
 0x1ad   :  { %v222_v27 = vpop.xlane.xlu0 %221 }
 0x1ae   :  { %v223_v28 = vsub.f32 %v216_v26, %v222_v27 }
 0x1b0   :  { %v224_v29 = vmul.f32 1.442695, %v223_v28 }
 0x1b2   :  { %309 = vpow2.f32 %v224_v29 }
 0x1bc   :  { %v310_v30 = vpop.eup %309 }
 0x1bd   :  { %226 = vadd.xlane.f32.xlu0 %v310_v30 }
 0x24a   :  { %v227_v31 = vpop.xlane.xlu0 %226 }
 0x24b   :  { %311 = vlog2.f32 %v227_v31 }
 0x255   :  { %v312_v32 = vpop.eup %311 }
 0x256   :  { %v229_v33 = vmul.f32 0.6931472, %v312_v32 }
 0x258   :  { %v230_v34 = vsub.f32 %v223_v28, %v229_v33 }
 0x25a   :  { %232 = vst.msk [vmem:[#allocation7] sm:$0xff] %vm231_vm0, %v230_v34 }
 0x25b   :  { %368 = shalt.err (!%p365_p6)
}
 0x25c   :  { %s369_s15 = scalar_lea.hbm %s459_s3, 128 }
 0x25d   :  { %p370_p7 = scmp.ne.s32.totalorder %s459_s3, %s369_s15  ;;  %p373_p8 = scmp.lt.u32.totalorder %s369_s15, %s459_s3 }
 0x25f   :  { %p375_p9 = pnand %p373_p8, %p370_p7 }
 0x261   :  { %378 = shalt.err (!%p375_p9)
}
 0x262   :  { %242 = dma.vmem_to_hbm [thread:$0]  %s240_s12, 128, %s459_s3, [#allocation4]  }
 0x263   :  { %383 = dma.done.wait [#allocation4], 128  }
 0x264   :  { %384 = vsyncadd [#allocation4], 4294967168 }
 0x265   :  { %246 = vsyncpa [#allocation3], 1 }
 0x266   :  { %247 = vsyncpa [#allocation6], 1 }
 0x267   :  { %248 = vsyncpa [#allocation4], 1 }

</bundles_post_ra>
